<compile_context>
chip_gen: v5e
topology: v5e:2x2
jax: 0.10.0
libtpu: 0.0.40
codegen_flags: <defaults>
</compile_context>

<pallas_src>
import functools

import numpy as np
import jax
import jax.numpy as jnp
from jax.experimental import pallas as pl
from jax.experimental.pallas import tpu as pltpu


# ---------------------------------------------------------------------------
# Glue: quant_lookup.__init__ parameter shapes and eval-mode _gen_table()
# ---------------------------------------------------------------------------
def _quant_range(n_bits, is_act):
    if is_act:
        return 2 ** n_bits - 1
    if n_bits == 1:
        return 1
    return 2 ** (n_bits - 1) - 1


def _make_table_q(granu, n_bits, is_act, table_param):
    """Eval-mode _gen_table(): returns the 1-D lookup table table_q[0, 0, :, 0]."""
    R = _quant_range(n_bits, is_act)
    GR = granu * R

    # buffer T: ones(2*GR - 1) with T[GR:] = 0
    T = np.ones(2 * GR - 1, dtype=np.float32)
    T[GR:] = 0.0

    # prob = one-hot(argmax over granu axis) of table (R, granu), flattened
    idx = np.argmax(np.asarray(table_param), axis=1)
    prob = np.zeros((R, granu), dtype=np.float32)
    prob[np.arange(R), idx] = 1.0
    prob = prob.reshape(-1)                                  # (GR,)

    # F.conv1d(prob, T, padding=GR-1)  (cross-correlation, PyTorch semantics)
    prob_p = np.pad(prob, (GR - 1, GR - 1))
    conv = np.array(
        [np.dot(prob_p[j:j + 2 * GR - 1], T) for j in range(GR)],
        dtype=np.float32,
    )

    if is_act:
        # F.pad(table_q, [0, 0, L+1, 0]) -> GR+1 leading zeros
        table_q = np.concatenate([np.zeros(GR + 1, np.float32), conv])
    elif n_bits == 1:
        table_q = np.concatenate([np.array([-1.0], np.float32), conv * 2.0 - 1.0])
    else:
        table_q = np.concatenate([-conv[::-1], np.zeros(1, np.float32), conv])
    return (table_q / R).astype(np.float32)


def _bin_edges(L, is_act):
    """Static bin boundaries in units of scale: idx <= j  <=>  x < scale*edge[j].

    Derived from the reference index math (clamp folds in automatically since
    the extreme bins' edges lie inside [-scale, scale]):
      act:    idx = round(clip(x/scale)*s) + s, s = L//2  -> edge_j = (j+0.5-s)/s
      weight: idx = round((clip(x/scale)+1)/2*s), s = L-1 -> edge_j = (2j+1)/s - 1
    """
    j = np.arange(L - 1, dtype=np.float64)
    if is_act:
        s = L // 2
        base = (j + 0.5 - s) / s
    else:
        s = L - 1
        base = (2.0 * j + 1.0) / s - 1.0
    return base.astype(np.float32)


# ---------------------------------------------------------------------------
# Pallas kernel: balanced binary threshold-compare tree (nearest-entry lookup)
# ---------------------------------------------------------------------------
def _lookup_kernel(edges_ref, table_ref, x_ref, o_ref, *, L):
    # Arithmetic in f32 regardless of storage dtype (v5e has no bf16 VALU).
    xv = x_ref[...].astype(jnp.float32)

    def select(lo, hi):
        # Quantized value for indices in [lo, hi); x < edges[j]  <=>  idx <= j.
        if hi - lo == 1:
            return table_ref[lo]                 # SMEM scalar, splat on use
        mid = (lo + hi) // 2
        return jnp.where(xv < edges_ref[mid - 1], select(lo, mid), select(mid, hi))

    res = select(0, L)
    o_ref[...] = jnp.broadcast_to(res, xv.shape).astype(o_ref.dtype)


# ---------------------------------------------------------------------------
# Wrapper
# ---------------------------------------------------------------------------
def quant_lookup_forward(x, *, granu, n_bits, is_act=True, table_param=None,
                         scale=None):
    """Eval-mode forward of quant_lookup.  x: any-shape f32/bf16 tensor.

    If `scale` is None the lazy-init branch is reproduced (scale = std(x)*3,
    unbiased); pass a cached scale for steady-state inference to skip the
    extra HBM pass over x.
    """
    R = _quant_range(n_bits, is_act)
    if table_param is None:
        # nn.Parameter(torch.zeros(range, granu))
        table_param = np.zeros((R, granu), dtype=np.float32)

    # Native f32 / bf16 I/O; anything else is upcast once.
    if jnp.dtype(x.dtype) not in (jnp.dtype(jnp.float32), jnp.dtype(jnp.bfloat16)):
        x = x.astype(jnp.float32)

    if scale is None:
        # Lazy init: scale = exp(log(x.std(unbiased)*3)) = x.std()*3.
        # Stable two-pass std (matches torch); cached-scale path skips this.
        scale = jnp.std(x.astype(jnp.float32), ddof=1) * 3.0
    scale = jnp.asarray(scale, jnp.float32).reshape(())
    # Guard the degenerate constant-input case (original torch would NaN here).
    safe_scale = jnp.maximum(scale, 1e-12)

    table_q = _make_table_q(granu, n_bits, is_act, table_param)
    L = int(table_q.shape[0])
    # Fold the affine index math and the trailing "* scale" into edges / table.
    edges = jnp.asarray(_bin_edges(L, is_act)) * safe_scale        # (L-1,) f32
    table_scaled = jnp.asarray(table_q) * safe_scale               # (L,)   f32

    # ---- tiling: lane-dense (rows, 512) slab, ragged last block allowed ----
    LANES = 512
    BLOCK_ROWS_MAX = 1024                      # 2 MiB f32 / 1 MiB bf16 per buffer
    itemsize = jnp.dtype(x.dtype).itemsize
    SUB = 8 if itemsize >= 4 else 16           # sublane packing granularity

    n = int(np.prod(x.shape))
    flat = x.reshape(-1)
    rows = pl.cdiv(n, LANES)
    padded = (rows * LANES != n)
    if padded:
        # Tail pad only (< LANES elements). Inputs divisible by 512 take the
        # zero-copy path (no pad, no trailing slice).
        flat = jnp.pad(flat, (0, rows * LANES - n))
    x2d = flat.reshape(rows, LANES)

    if rows <= SUB:
        block_rows = rows                      # whole-array block (tiny input)
    else:
        # >=2 grid blocks so both v7x TensorCores get work; rows multiple of the
        # sublane packing; capped so in+out double buffering stays <=8 MiB.
        half = pl.cdiv(rows, 2)
        block_rows = min(BLOCK_ROWS_MAX, pl.cdiv(half, SUB) * SUB)
    grid = (pl.cdiv(rows, block_rows),)        # last block may be ragged (masked)

    kernel = functools.partial(_lookup_kernel, L=L)
    out2d = pl.pallas_call(
        kernel,
        out_shape=jax.ShapeDtypeStruct((rows, LANES), x2d.dtype),
        grid=grid,
        in_specs=[
            pl.BlockSpec(memory_space=pltpu.SMEM),                 # edges (L-1,)
            pl.BlockSpec(memory_space=pltpu.SMEM),                 # table (L,)
            pl.BlockSpec((block_rows, LANES), lambda i: (i, 0)),   # x tile
        ],
        out_specs=pl.BlockSpec((block_rows, LANES), lambda i: (i, 0)),
        compiler_params=pltpu.CompilerParams(
            dimension_semantics=("parallel",),   # elementwise -> shard across TCs
        ),
    )(edges, table_scaled, x2d)

    out_flat = out2d.reshape(-1)
    if padded:
        out_flat = out_flat[:n]
    return out_flat.reshape(x.shape)


# ---------------------------------------------------------------------------
if __name__ == "__main__":
    key = jax.random.PRNGKey(0)
    k1, k2, k3 = jax.random.split(key, 3)

    # Activation quantizer: NCHW batch=2, channels=4, spatial=16; granu=4, n_bits=2
    x = jax.random.normal(k1, (2, 4, 16, 16), dtype=jnp.float32)
    y = quant_lookup_forward(x, granu=4, n_bits=2, is_act=True)
    jax.block_until_ready(y)
    assert y.shape == x.shape and y.dtype == x.dtype

    # Sanity check vs a pure-JAX reference of the eval-mode lookup. >=99% exact
    # match (tolerates ulp-level bin-edge flips from the folded threshold form).
    def _ref(xv, granu, n_bits, is_act, sc):
        tp = np.zeros((_quant_range(n_bits, is_act), granu), np.float32)
        tq = jnp.asarray(_make_table_q(granu, n_bits, is_act, tp))
        g = jnp.clip(xv / sc, -1.0, 1.0)
        Lr = tq.shape[0]
        if is_act:
            s = Lr // 2
            idx = jnp.round(g * s).astype(jnp.int32) + s
        else:
            s = Lr - 1
            idx = jnp.round((g + 1.0) * 0.5 * s).astype(jnp.int32)
        return jnp.take(tq, idx) * sc

    scale_a = jnp.std(x, ddof=1) * 3.0
    y_ref = _ref(x, 4, 2, True, scale_a)
    match = float(jnp.mean((y == y_ref).astype(jnp.float32)))
    assert match >= 0.99, f"reference mismatch fraction too high: {1.0 - match}"

    # Weight quantizer path (n_bits > 1), cached-scale fast path
    w = jax.random.normal(k2, (4, 4, 3, 3), dtype=jnp.float32)
    wq = quant_lookup_forward(w, granu=4, n_bits=3, is_act=False, scale=1.5)
    jax.block_until_ready(wq)
    assert wq.shape == w.shape

    # Native bf16 I/O path
    xb = jax.random.normal(k3, (2, 8, 16, 16), dtype=jnp.bfloat16)
    yb = quant_lookup_forward(xb, granu=4, n_bits=2, is_act=True, scale=2.0)
    jax.block_until_ready(yb)
    assert yb.shape == xb.shape and yb.dtype == jnp.bfloat16

    print("KERNEL_OK")
</pallas_src>

<mosaic_0001>
module attributes {stable_mosaic.version = 11 : i64} {
  func.func @_lookup_kernel(%arg0: i32, %arg1: memref<24xf32, #tpu.memory_space<smem>>, %arg2: memref<25xf32, #tpu.memory_space<smem>>, %arg3: memref<4x512xf32, #tpu.memory_space<vmem>>, %arg4: memref<4x512xf32, #tpu.memory_space<vmem>>) attributes {dimension_semantics = [#tpu.dimension_semantics<parallel>], iteration_bounds = array<i64: 1>, scalar_prefetch = 0 : i64, scratch_operands = 0 : i64, tpu.core_type = #tpu.core_type<tc>, window_params = [{transform_indices = @transform_0, window_bounds = array<i64: 24>}, {transform_indices = @transform_1, window_bounds = array<i64: 25>}, {transform_indices = @transform_2, window_bounds = array<i64: 4, 512>}, {transform_indices = @transform_3, window_bounds = array<i64: 4, 512>}]} {
    %c0 = arith.constant 0 : index
    %c0_0 = arith.constant 0 : index
    %0 = vector.load %arg3[%c0, %c0_0] : memref<4x512xf32, #tpu.memory_space<vmem>>, vector<4x512xf32>
    %c11 = arith.constant 11 : index
    %1 = memref.load %arg1[%c11] : memref<24xf32, #tpu.memory_space<smem>>
    %2 = vector.broadcast %1 : f32 to vector<4x512xf32>
    %3 = arith.cmpf olt, %0, %2 : vector<4x512xf32>
    %c5 = arith.constant 5 : index
    %4 = memref.load %arg1[%c5] : memref<24xf32, #tpu.memory_space<smem>>
    %5 = vector.broadcast %4 : f32 to vector<4x512xf32>
    %6 = arith.cmpf olt, %0, %5 : vector<4x512xf32>
    %c2 = arith.constant 2 : index
    %7 = memref.load %arg1[%c2] : memref<24xf32, #tpu.memory_space<smem>>
    %8 = vector.broadcast %7 : f32 to vector<4x512xf32>
    %9 = arith.cmpf olt, %0, %8 : vector<4x512xf32>
    %c0_1 = arith.constant 0 : index
    %10 = memref.load %arg1[%c0_1] : memref<24xf32, #tpu.memory_space<smem>>
    %11 = vector.broadcast %10 : f32 to vector<4x512xf32>
    %12 = arith.cmpf olt, %0, %11 : vector<4x512xf32>
    %c0_2 = arith.constant 0 : index
    %13 = memref.load %arg2[%c0_2] : memref<25xf32, #tpu.memory_space<smem>>
    %c1 = arith.constant 1 : index
    %14 = memref.load %arg1[%c1] : memref<24xf32, #tpu.memory_space<smem>>
    %15 = vector.broadcast %14 : f32 to vector<4x512xf32>
    %16 = arith.cmpf olt, %0, %15 : vector<4x512xf32>
    %c1_3 = arith.constant 1 : index
    %17 = memref.load %arg2[%c1_3] : memref<25xf32, #tpu.memory_space<smem>>
    %c2_4 = arith.constant 2 : index
    %18 = memref.load %arg2[%c2_4] : memref<25xf32, #tpu.memory_space<smem>>
    %19 = vector.broadcast %17 : f32 to vector<4x512xf32>
    %20 = vector.broadcast %18 : f32 to vector<4x512xf32>
    %21 = arith.select %16, %19, %20 : vector<4x512xi1>, vector<4x512xf32>
    %22 = vector.broadcast %13 : f32 to vector<4x512xf32>
    %23 = arith.select %12, %22, %21 : vector<4x512xi1>, vector<4x512xf32>
    %c3 = arith.constant 3 : index
    %24 = memref.load %arg1[%c3] : memref<24xf32, #tpu.memory_space<smem>>
    %25 = vector.broadcast %24 : f32 to vector<4x512xf32>
    %26 = arith.cmpf olt, %0, %25 : vector<4x512xf32>
    %c3_5 = arith.constant 3 : index
    %27 = memref.load %arg2[%c3_5] : memref<25xf32, #tpu.memory_space<smem>>
    %c4 = arith.constant 4 : index
    %28 = memref.load %arg1[%c4] : memref<24xf32, #tpu.memory_space<smem>>
    %29 = vector.broadcast %28 : f32 to vector<4x512xf32>
    %30 = arith.cmpf olt, %0, %29 : vector<4x512xf32>
    %c4_6 = arith.constant 4 : index
    %31 = memref.load %arg2[%c4_6] : memref<25xf32, #tpu.memory_space<smem>>
    %c5_7 = arith.constant 5 : index
    %32 = memref.load %arg2[%c5_7] : memref<25xf32, #tpu.memory_space<smem>>
    %33 = vector.broadcast %31 : f32 to vector<4x512xf32>
    %34 = vector.broadcast %32 : f32 to vector<4x512xf32>
    %35 = arith.select %30, %33, %34 : vector<4x512xi1>, vector<4x512xf32>
    %36 = vector.broadcast %27 : f32 to vector<4x512xf32>
    %37 = arith.select %26, %36, %35 : vector<4x512xi1>, vector<4x512xf32>
    %38 = arith.select %9, %23, %37 : vector<4x512xi1>, vector<4x512xf32>
    %c8 = arith.constant 8 : index
    %39 = memref.load %arg1[%c8] : memref<24xf32, #tpu.memory_space<smem>>
    %40 = vector.broadcast %39 : f32 to vector<4x512xf32>
    %41 = arith.cmpf olt, %0, %40 : vector<4x512xf32>
    %c6 = arith.constant 6 : index
    %42 = memref.load %arg1[%c6] : memref<24xf32, #tpu.memory_space<smem>>
    %43 = vector.broadcast %42 : f32 to vector<4x512xf32>
    %44 = arith.cmpf olt, %0, %43 : vector<4x512xf32>
    %c6_8 = arith.constant 6 : index
    %45 = memref.load %arg2[%c6_8] : memref<25xf32, #tpu.memory_space<smem>>
    %c7 = arith.constant 7 : index
    %46 = memref.load %arg1[%c7] : memref<24xf32, #tpu.memory_space<smem>>
    %47 = vector.broadcast %46 : f32 to vector<4x512xf32>
    %48 = arith.cmpf olt, %0, %47 : vector<4x512xf32>
    %c7_9 = arith.constant 7 : index
    %49 = memref.load %arg2[%c7_9] : memref<25xf32, #tpu.memory_space<smem>>
    %c8_10 = arith.constant 8 : index
    %50 = memref.load %arg2[%c8_10] : memref<25xf32, #tpu.memory_space<smem>>
    %51 = vector.broadcast %49 : f32 to vector<4x512xf32>
    %52 = vector.broadcast %50 : f32 to vector<4x512xf32>
    %53 = arith.select %48, %51, %52 : vector<4x512xi1>, vector<4x512xf32>
    %54 = vector.broadcast %45 : f32 to vector<4x512xf32>
    %55 = arith.select %44, %54, %53 : vector<4x512xi1>, vector<4x512xf32>
    %c9 = arith.constant 9 : index
    %56 = memref.load %arg1[%c9] : memref<24xf32, #tpu.memory_space<smem>>
    %57 = vector.broadcast %56 : f32 to vector<4x512xf32>
    %58 = arith.cmpf olt, %0, %57 : vector<4x512xf32>
    %c9_11 = arith.constant 9 : index
    %59 = memref.load %arg2[%c9_11] : memref<25xf32, #tpu.memory_space<smem>>
    %c10 = arith.constant 10 : index
    %60 = memref.load %arg1[%c10] : memref<24xf32, #tpu.memory_space<smem>>
    %61 = vector.broadcast %60 : f32 to vector<4x512xf32>
    %62 = arith.cmpf olt, %0, %61 : vector<4x512xf32>
    %c10_12 = arith.constant 10 : index
    %63 = memref.load %arg2[%c10_12] : memref<25xf32, #tpu.memory_space<smem>>
    %c11_13 = arith.constant 11 : index
    %64 = memref.load %arg2[%c11_13] : memref<25xf32, #tpu.memory_space<smem>>
    %65 = vector.broadcast %63 : f32 to vector<4x512xf32>
    %66 = vector.broadcast %64 : f32 to vector<4x512xf32>
    %67 = arith.select %62, %65, %66 : vector<4x512xi1>, vector<4x512xf32>
    %68 = vector.broadcast %59 : f32 to vector<4x512xf32>
    %69 = arith.select %58, %68, %67 : vector<4x512xi1>, vector<4x512xf32>
    %70 = arith.select %41, %55, %69 : vector<4x512xi1>, vector<4x512xf32>
    %71 = arith.select %6, %38, %70 : vector<4x512xi1>, vector<4x512xf32>
    %c17 = arith.constant 17 : index
    %72 = memref.load %arg1[%c17] : memref<24xf32, #tpu.memory_space<smem>>
    %73 = vector.broadcast %72 : f32 to vector<4x512xf32>
    %74 = arith.cmpf olt, %0, %73 : vector<4x512xf32>
    %c14 = arith.constant 14 : index
    %75 = memref.load %arg1[%c14] : memref<24xf32, #tpu.memory_space<smem>>
    %76 = vector.broadcast %75 : f32 to vector<4x512xf32>
    %77 = arith.cmpf olt, %0, %76 : vector<4x512xf32>
    %c12 = arith.constant 12 : index
    %78 = memref.load %arg1[%c12] : memref<24xf32, #tpu.memory_space<smem>>
    %79 = vector.broadcast %78 : f32 to vector<4x512xf32>
    %80 = arith.cmpf olt, %0, %79 : vector<4x512xf32>
    %c12_14 = arith.constant 12 : index
    %81 = memref.load %arg2[%c12_14] : memref<25xf32, #tpu.memory_space<smem>>
    %c13 = arith.constant 13 : index
    %82 = memref.load %arg1[%c13] : memref<24xf32, #tpu.memory_space<smem>>
    %83 = vector.broadcast %82 : f32 to vector<4x512xf32>
    %84 = arith.cmpf olt, %0, %83 : vector<4x512xf32>
    %c13_15 = arith.constant 13 : index
    %85 = memref.load %arg2[%c13_15] : memref<25xf32, #tpu.memory_space<smem>>
    %c14_16 = arith.constant 14 : index
    %86 = memref.load %arg2[%c14_16] : memref<25xf32, #tpu.memory_space<smem>>
    %87 = vector.broadcast %85 : f32 to vector<4x512xf32>
    %88 = vector.broadcast %86 : f32 to vector<4x512xf32>
    %89 = arith.select %84, %87, %88 : vector<4x512xi1>, vector<4x512xf32>
    %90 = vector.broadcast %81 : f32 to vector<4x512xf32>
    %91 = arith.select %80, %90, %89 : vector<4x512xi1>, vector<4x512xf32>
    %c15 = arith.constant 15 : index
    %92 = memref.load %arg1[%c15] : memref<24xf32, #tpu.memory_space<smem>>
    %93 = vector.broadcast %92 : f32 to vector<4x512xf32>
    %94 = arith.cmpf olt, %0, %93 : vector<4x512xf32>
    %c15_17 = arith.constant 15 : index
    %95 = memref.load %arg2[%c15_17] : memref<25xf32, #tpu.memory_space<smem>>
    %c16 = arith.constant 16 : index
    %96 = memref.load %arg1[%c16] : memref<24xf32, #tpu.memory_space<smem>>
    %97 = vector.broadcast %96 : f32 to vector<4x512xf32>
    %98 = arith.cmpf olt, %0, %97 : vector<4x512xf32>
    %c16_18 = arith.constant 16 : index
    %99 = memref.load %arg2[%c16_18] : memref<25xf32, #tpu.memory_space<smem>>
    %c17_19 = arith.constant 17 : index
    %100 = memref.load %arg2[%c17_19] : memref<25xf32, #tpu.memory_space<smem>>
    %101 = vector.broadcast %99 : f32 to vector<4x512xf32>
    %102 = vector.broadcast %100 : f32 to vector<4x512xf32>
    %103 = arith.select %98, %101, %102 : vector<4x512xi1>, vector<4x512xf32>
    %104 = vector.broadcast %95 : f32 to vector<4x512xf32>
    %105 = arith.select %94, %104, %103 : vector<4x512xi1>, vector<4x512xf32>
    %106 = arith.select %77, %91, %105 : vector<4x512xi1>, vector<4x512xf32>
    %c20 = arith.constant 20 : index
    %107 = memref.load %arg1[%c20] : memref<24xf32, #tpu.memory_space<smem>>
    %108 = vector.broadcast %107 : f32 to vector<4x512xf32>
    %109 = arith.cmpf olt, %0, %108 : vector<4x512xf32>
    %c18 = arith.constant 18 : index
    %110 = memref.load %arg1[%c18] : memref<24xf32, #tpu.memory_space<smem>>
    %111 = vector.broadcast %110 : f32 to vector<4x512xf32>
    %112 = arith.cmpf olt, %0, %111 : vector<4x512xf32>
    %c18_20 = arith.constant 18 : index
    %113 = memref.load %arg2[%c18_20] : memref<25xf32, #tpu.memory_space<smem>>
    %c19 = arith.constant 19 : index
    %114 = memref.load %arg1[%c19] : memref<24xf32, #tpu.memory_space<smem>>
    %115 = vector.broadcast %114 : f32 to vector<4x512xf32>
    %116 = arith.cmpf olt, %0, %115 : vector<4x512xf32>
    %c19_21 = arith.constant 19 : index
    %117 = memref.load %arg2[%c19_21] : memref<25xf32, #tpu.memory_space<smem>>
    %c20_22 = arith.constant 20 : index
    %118 = memref.load %arg2[%c20_22] : memref<25xf32, #tpu.memory_space<smem>>
    %119 = vector.broadcast %117 : f32 to vector<4x512xf32>
    %120 = vector.broadcast %118 : f32 to vector<4x512xf32>
    %121 = arith.select %116, %119, %120 : vector<4x512xi1>, vector<4x512xf32>
    %122 = vector.broadcast %113 : f32 to vector<4x512xf32>
    %123 = arith.select %112, %122, %121 : vector<4x512xi1>, vector<4x512xf32>
    %c22 = arith.constant 22 : index
    %124 = memref.load %arg1[%c22] : memref<24xf32, #tpu.memory_space<smem>>
    %125 = vector.broadcast %124 : f32 to vector<4x512xf32>
    %126 = arith.cmpf olt, %0, %125 : vector<4x512xf32>
    %c21 = arith.constant 21 : index
    %127 = memref.load %arg1[%c21] : memref<24xf32, #tpu.memory_space<smem>>
    %128 = vector.broadcast %127 : f32 to vector<4x512xf32>
    %129 = arith.cmpf olt, %0, %128 : vector<4x512xf32>
    %c21_23 = arith.constant 21 : index
    %130 = memref.load %arg2[%c21_23] : memref<25xf32, #tpu.memory_space<smem>>
    %c22_24 = arith.constant 22 : index
    %131 = memref.load %arg2[%c22_24] : memref<25xf32, #tpu.memory_space<smem>>
    %132 = vector.broadcast %130 : f32 to vector<4x512xf32>
    %133 = vector.broadcast %131 : f32 to vector<4x512xf32>
    %134 = arith.select %129, %132, %133 : vector<4x512xi1>, vector<4x512xf32>
    %c23 = arith.constant 23 : index
    %135 = memref.load %arg1[%c23] : memref<24xf32, #tpu.memory_space<smem>>
    %136 = vector.broadcast %135 : f32 to vector<4x512xf32>
    %137 = arith.cmpf olt, %0, %136 : vector<4x512xf32>
    %c23_25 = arith.constant 23 : index
    %138 = memref.load %arg2[%c23_25] : memref<25xf32, #tpu.memory_space<smem>>
    %c24 = arith.constant 24 : index
    %139 = memref.load %arg2[%c24] : memref<25xf32, #tpu.memory_space<smem>>
    %140 = vector.broadcast %138 : f32 to vector<4x512xf32>
    %141 = vector.broadcast %139 : f32 to vector<4x512xf32>
    %142 = arith.select %137, %140, %141 : vector<4x512xi1>, vector<4x512xf32>
    %143 = arith.select %126, %134, %142 : vector<4x512xi1>, vector<4x512xf32>
    %144 = arith.select %109, %123, %143 : vector<4x512xi1>, vector<4x512xf32>
    %145 = arith.select %74, %106, %144 : vector<4x512xi1>, vector<4x512xf32>
    %146 = arith.select %3, %71, %145 : vector<4x512xi1>, vector<4x512xf32>
    %c0_26 = arith.constant 0 : index
    %c0_27 = arith.constant 0 : index
    %147 = vector.load %arg4[%c0_26, %c0_27] : memref<4x512xf32, #tpu.memory_space<vmem>>, vector<4x512xf32>
    tpu.vector_store %arg4[%c0_26, %c0_27], %146 {strides = array<i32>} : memref<4x512xf32, #tpu.memory_space<vmem>>, vector<4x512xf32>,
    return
  }
  func.func @transform_0(%arg0: i32) -> i32 {
    %c0_i32 = arith.constant 0 : i32
    %c0_i32_0 = arith.constant 0 : i32
    return %c0_i32 : i32
  }
  func.func @transform_1(%arg0: i32) -> i32 {
    %c0_i32 = arith.constant 0 : i32
    %c0_i32_0 = arith.constant 0 : i32
    return %c0_i32 : i32
  }
  func.func @transform_2(%arg0: i32) -> (i32, i32) {
    %c0_i32 = arith.constant 0 : i32
    %c0_i32_0 = arith.constant 0 : i32
    return %arg0, %c0_i32 : i32, i32
  }
  func.func @transform_3(%arg0: i32) -> (i32, i32) {
    %c0_i32 = arith.constant 0 : i32
    %c0_i32_0 = arith.constant 0 : i32
    return %arg0, %c0_i32 : i32, i32
  }
}

</mosaic_0001>

<bundles_post_ra>
// kernel: tpu_custom_call.1
= control target key start
LH: loop header
LB: loop body
LE: loop exit
PB: predicated region body
PF: predicated region fallthrough
CT: control target
= control target key end

     0   :  { %8 = vsyncpa [#allocation5], 0  ;;  %s915_s0 = inlined_call_operand.hbm [shape: f32[24], index: 0, kind: input, shape index: {}]   ;;  %s916_s1 = inlined_call_operand.hbm [shape: f32[25], index: 1, kind: input, shape index: {}]   ;;  %s917_s2 = inlined_call_operand.hbm [shape: f32[4,512], index: 2, kind: input, shape index: {}]   ;;  %s918_s3 = inlined_call_operand.hbm [shape: f32[4,512], index: 3, kind: output, shape index: {}]  }
   0x1   :  { %9 = vsyncpa [#allocation7], 0 }
   0x2   :  { %10 = vsyncpa [#allocation3], 0 }
   0x3   :  { %11 = vsyncpa [#allocation4], 0  ;;  %s17_s14 = sshll.u32 %s915_s0, 4  ;;  %s26_s17 = sshll.u32 %s916_s1, 4  ;;  %s18_s14 = int_to_ptr.hbm [resolvable:$true] %s17_s14  ;;  %s27_s17 = int_to_ptr.hbm [resolvable:$true] %s26_s17 }
   0x4   :  { %s402_s18 = smov [#allocation2]   ;;  %s403_s19 = smov [#allocation6]  }
   0x5   :  { %20 = dma.hbm_to_smem %s18_s14, 16, %s402_s18, [#allocation5]  }
   0x6   :  { %29 = dma.hbm_to_smem %s27_s17, 16, %s403_s19, [#allocation7]  }
   0x7   :  { %s35_s22 = sshll.u32 %s917_s2, 4  ;;  %s404_s23 = smov [#allocation8]   ;;  %s36_s22 = int_to_ptr.hbm [resolvable:$true] %s35_s22 }
   0x8   :  { %s37_s24 = sshll.u32 %s404_s23, 4  ;;  %s38_s24 = int_to_ptr.vmem [resolvable:$true] %s37_s24 }
   0x9   :  { %40 = dma.hbm_to_vmem [thread:$0]  %s36_s22, 256, %s38_s24, [#allocation3]  }
   0xa   :  { %394 = dma.done.wait [#allocation5], 16  }
   0xb   :  { %395 = vsyncadd [#allocation5], 4294967280 }
   0xc   :  { %396 = dma.done.wait [#allocation7], 16  }
   0xd   :  { %397 = vsyncadd [#allocation7], 4294967280 }
   0xe   :  { %398 = dma.done.wait [#allocation3], 256  }
   0xf   :  { %399 = vsyncadd [#allocation3], 4294967040 }
  0x10   :  { %53 = sfence }
  0x11   :  { %s435_s0 = sld [smem:[#allocation2 + $0xb]]  ;;  %v475_v0 = vld [vmem:[#allocation8] sm:$0xff]  ;;  %v477_v1 = vld [vmem:[#allocation8 + $0x8] sm:$0xff] }
  0x12   :  { %s437_s1 = sld [smem:[#allocation2 + $0x5]] }
  0x13   :  { %s439_s25 = sld [smem:[#allocation2 + $0x2]] }
  0x14   :  { %s441_s26 = sld [smem:[#allocation2]] }
  0x15   :  { %s443_s2 = sld [smem:[#allocation6]] }
  0x16   :  { %s274_s27 = sld [smem:[#allocation2 + $0x1]] }
  0x17   :  { %s445_s28 = sld [smem:[#allocation6 + $0x1]]  ;;  %v57_v58 = vstv %s435_s0 }
  0x18   :  { %s447_s29 = sld [smem:[#allocation6 + $0x2]]  ;;  %v61_v59 = vstv %s437_s1 }
  0x19   :  { %s449_s30 = sld [smem:[#allocation2 + $0x3]]  ;;  %v65_v7 = vstv %s439_s25 }
  0x1a   :  { %s451_s4 = sld [smem:[#allocation6 + $0x3]]  ;;  %v69_v3 = vstv %s441_s26  ;;  %vm521_vm5 = vcmp.lt.f32.partialorder %v475_v0, %v65_v7 }
  0x1b   :  { %s453_s5 = sld [smem:[#allocation2 + $0x4]]  ;;  %vm495_vm2 = vcmp.lt.f32.partialorder %v475_v0, %v69_v3  ;;  %vm513_vm4 = vcmp.lt.f32.partialorder %v477_v1, %v69_v3  ;;  %v83_v17 = vstv %s443_s2 }
  0x1c   :  { %s455_s6 = sld [smem:[#allocation6 + $0x4]]  ;;  %v74_v2 = vstv %s274_s27 }
  0x1d   :  { %s457_s7 = sld [smem:[#allocation6 + $0x5]]  ;;  %vm75_vm0 = vcmp.lt.f32.partialorder %v475_v0, %v74_v2  ;;  %vm76_vm1 = vcmp.lt.f32.partialorder %v477_v1, %v74_v2  ;;  %v79_v5 = vstv %s445_s28 }
  0x1e   :  { %s459_s8 = sld [smem:[#allocation2 + $0x8]]  ;;  %v80_v6 = vstv %s447_s29 }
  0x1f   :  { %s461_s9 = sld [smem:[#allocation2 + $0x6]]  ;;  %v87_v9 = vstv %s449_s30  ;;  %v81_v15 = vsel %vm75_vm0, %v79_v5, %v80_v6  ;;  %v82_v16 = vsel %vm76_vm1, %v79_v5, %v80_v6  ;;  %vm612_vm1 = vcmp.lt.f32.partialorder %v477_v1, %v65_v7 }
  0x20   :  { %s463_s10 = sld [smem:[#allocation6 + $0x6]]  ;;  %vm526_vm6 = vcmp.lt.f32.partialorder %v475_v0, %v87_v9  ;;  %vm531_vm7 = vcmp.lt.f32.partialorder %v477_v1, %v87_v9  ;;  %v101_v21 = vstv %s451_s4  ;;  %v618_v47 = vsel %vm495_vm2, %v83_v17, %v81_v15 }
  0x21   :  { %s465_s11 = sld [smem:[#allocation2 + $0x7]]  ;;  %v92_v4 = vstv %s453_s5  ;;  %v622_v48 = vsel %vm513_vm4, %v83_v17, %v82_v16 }
  0x22   :  { %s467_s12 = sld [smem:[#allocation6 + $0x7]]  ;;  %vm503_vm3 = vcmp.lt.f32.partialorder %v475_v0, %v92_v4  ;;  %v97_v11 = vstv %s455_s6  ;;  %vm94_vm8 = vcmp.lt.f32.partialorder %v477_v1, %v92_v4 }
  0x23   :  { %s469_s13 = sld [smem:[#allocation6 + $0x8]]  ;;  %v98_v12 = vstv %s457_s7 }
  0x24   :  { %s471_s14 = sld [smem:[#allocation2 + $0x9]]  ;;  %v99_v23 = vsel %vm503_vm3, %v97_v11, %v98_v12  ;;  %v100_v34 = vsel %vm94_vm8, %v97_v11, %v98_v12  ;;  %v107_v35 = vstv %s459_s8 }
  0x25   :  { %s473_s15 = sld [smem:[#allocation6 + $0x9]]  ;;  %v111_v24 = vstv %s461_s9  ;;  %v626_v49 = vsel %vm526_vm6, %v101_v21, %v99_v23  ;;  %v632_v50 = vsel %vm531_vm7, %v101_v21, %v100_v34  ;;  %vm635_vm3 = vcmp.lt.f32.partialorder %v475_v0, %v107_v35 }
  0x26   :  { %s479_s16 = sld [smem:[#allocation2 + $0xa]]  ;;  %vm576_vm13 = vcmp.lt.f32.partialorder %v475_v0, %v111_v24  ;;  %v125_v37 = vstv %s463_s10  ;;  %vm584_vm14 = vcmp.lt.f32.partialorder %v477_v1, %v111_v24  ;;  %vm640_vm2 = vcmp.lt.f32.partialorder %v477_v1, %v107_v35 }
  0x27   :  { %s482_s17 = sld [smem:[#allocation6 + $0xa]]  ;;  %v116_v13 = vstv %s465_s11  ;;  %v104_v60 = vsel %vm521_vm5, %v618_v47, %v626_v49  ;;  %v105_v61 = vsel %vm612_vm1, %v622_v48, %v632_v50  ;;  %v971_v24 = vmov 0 }
  0x28   :  { %s485_s18 = sld [smem:[#allocation6 + $0xb]]  ;;  %vm544_vm9 = vcmp.lt.f32.partialorder %v475_v0, %v116_v13  ;;  %vm551_vm10 = vcmp.lt.f32.partialorder %v477_v1, %v116_v13  ;;  %v121_v27 = vstv %s467_s12  ;;  %v979_v34 = vmov 0 }
  0x29   :  { %s491_s19 = sld [smem:[#allocation2 + $0x11]]  ;;  %v122_v28 = vstv %s469_s13 }
  0x2a   :  { %s500_s20 = sld [smem:[#allocation2 + $0xe]]  ;;  %v129_v29 = vstv %s471_s14  ;;  %v123_v39 = vsel %vm544_vm9, %v121_v27, %v122_v28  ;;  %v124_v40 = vsel %vm551_vm10, %v121_v27, %v122_v28  ;;  %s405_s14 = smov [#allocation9]  }
  0x2b   :  { %s510_s21 = sld [smem:[#allocation2 + $0xc]]  ;;  %vm593_vm15 = vcmp.lt.f32.partialorder %v475_v0, %v129_v29  ;;  %vm600_vm0 = vcmp.lt.f32.partialorder %v477_v1, %v129_v29  ;;  %v143_v45 = vstv %s473_s15  ;;  %v646_v53 = vsel %vm576_vm13, %v125_v37, %v123_v39  ;;  %s257_s15 = sshll.u32 %s405_s14, 4  ;;  %s258_s15 = int_to_ptr.vmem [resolvable:$true] %s257_s15 }
  0x2c   :  { %s518_s22 = sld [smem:[#allocation6 + $0xc]]  ;;  %v134_v22 = vstv %s479_s16  ;;  %v652_v54 = vsel %vm584_vm14, %v125_v37, %v124_v40  ;;  %vm752_vm13 = vcmp.lt.f32.partialorder %v475_v0, %v61_v59  ;;  %vm757_vm14 = vcmp.lt.f32.partialorder %v477_v1, %v61_v59 }
  0x2d   :  { %s537_s23 = sld [smem:[#allocation2 + $0xd]]  ;;  %vm561_vm11 = vcmp.lt.f32.partialorder %v475_v0, %v134_v22  ;;  %vm566_vm12 = vcmp.lt.f32.partialorder %v477_v1, %v134_v22  ;;  %v139_v32 = vstv %s482_s17  ;;  %v972_v24 = vsel %vm757_vm14, 4294967295, %v971_v24 }
  0x2e   :  { %s548_s24 = sld [smem:[#allocation6 + $0xd]]  ;;  %v140_v33 = vstv %s485_s18  ;;  %v983_v39 = vmov 0  ;;  %v985_v40 = vmov 0  ;;  %s259_s18 = sshll.u32 %s918_s3, 4  ;;  %s260_s18 = int_to_ptr.hbm [resolvable:$true] %s259_s18 }
  0x2f   :  { %s558_s25 = sld [smem:[#allocation6 + $0xe]]  ;;  %v141_v43 = vsel %vm561_vm11, %v139_v32, %v140_v33  ;;  %v142_v44 = vsel %vm566_vm12, %v139_v32, %v140_v33  ;;  %v151_v62 = vstv %s491_s19  ;;  %v977_v33 = vmov 0 }
  0x30   :  { %s572_s26 = sld [smem:[#allocation2 + $0xf]]  ;;  %v656_v55 = vsel %vm593_vm15, %v143_v45, %v141_v43  ;;  %v660_v56 = vsel %vm600_vm0, %v143_v45, %v142_v44  ;;  %v155_v14 = vstv %s500_s20  ;;  %v987_v44 = vmov 0 }
  0x31   :  { %s581_s2 = sld [smem:[#allocation6 + $0xf]]  ;;  %v146_v2 = vsel %vm635_vm3, %v646_v53, %v656_v55  ;;  %v147_v3 = vsel %vm640_vm2, %v652_v54, %v660_v56  ;;  %v159_v4 = vstv %s510_s21  ;;  %vm770_vm15 = vcmp.lt.f32.partialorder %v475_v0, %v155_v14 }
  0x32   :  { %s597_s27 = sld [smem:[#allocation2 + $0x10]]  ;;  %vm723_vm9 = vcmp.lt.f32.partialorder %v475_v0, %v159_v4  ;;  %vm728_vm10 = vcmp.lt.f32.partialorder %v477_v1, %v159_v4  ;;  %v173_v17 = vstv %s518_s22  ;;  %vm775_vm0 = vcmp.lt.f32.partialorder %v477_v1, %v155_v14 }
  0x33   :  { %s609_s28 = sld [smem:[#allocation6 + $0x10]]  ;;  %v164_v57 = vstv %s537_s23  ;;  %vm999_vm3 = vnez %v972_v24 }
  0x34   :  { %s628_s29 = sld [smem:[#allocation6 + $0x11]]  ;;  %vm691_vm4 = vcmp.lt.f32.partialorder %v475_v0, %v164_v57  ;;  %vm698_vm6 = vcmp.lt.f32.partialorder %v477_v1, %v164_v57  ;;  %v169_v7 = vstv %s548_s24  ;;  %v149_v51 = vsel %vm999_vm3, %v105_v61, %v147_v3 }
  0x35   :  { %s648_s30 = sld [smem:[#allocation2 + $0x14]]  ;;  %v170_v8 = vstv %s558_s25 }
  0x36   :  { %s663_s4 = sld [smem:[#allocation2 + $0x12]]  ;;  %v177_v9 = vstv %s572_s26  ;;  %v171_v19 = vsel %vm691_vm4, %v169_v7, %v170_v8  ;;  %v172_v20 = vsel %vm698_vm6, %v169_v7, %v170_v8  ;;  %vm784_vm4 = vcmp.lt.f32.partialorder %v475_v0, %v151_v62 }
  0x37   :  { %s667_s5 = sld [smem:[#allocation6 + $0x12]]  ;;  %vm740_vm11 = vcmp.lt.f32.partialorder %v475_v0, %v177_v9  ;;  %vm745_vm12 = vcmp.lt.f32.partialorder %v477_v1, %v177_v9  ;;  %v191_v27 = vstv %s581_s2  ;;  %v978_v33 = vsel %vm784_vm4, 4294967295, %v977_v33 }
  0x38   :  { %v182_v63 = vstv %s597_s27  ;;  %s679_s6 = sld [smem:[#allocation2 + $0x13]]  ;;  %vm789_vm6 = vcmp.lt.f32.partialorder %v477_v1, %v151_v62  ;;  %v174_v35 = vsel %vm723_vm9, %v173_v17, %v171_v19  ;;  %v175_v41 = vsel %vm728_vm10, %v173_v17, %v172_v20 }
  0x39   :  { %s695_s0 = sld [smem:[#allocation6 + $0x13]]  ;;  %vm708_vm7 = vcmp.lt.f32.partialorder %v475_v0, %v182_v63  ;;  %vm713_vm8 = vcmp.lt.f32.partialorder %v477_v1, %v182_v63  ;;  %v187_v12 = vstv %s609_s28  ;;  %v980_v34 = vsel %vm789_vm6, 4294967295, %v979_v34 }
  0x3a   :  { %s705_s1 = sld [smem:[#allocation6 + $0x14]]  ;;  %v188_v13 = vstv %s628_s29  ;;  %vm810_vm6 = vcmp.lt.f32.partialorder %v477_v1, %v57_v58  ;;  %vm1001_vm1 = vnez %v978_v33  ;;  %vm1002_vm2 = vnez %v980_v34 }
  0x3b   :  { %s719_s7 = sld [smem:[#allocation2 + $0x16]]  ;;  %v189_v25 = vsel %vm708_vm7, %v187_v12, %v188_v13  ;;  %v190_v26 = vsel %vm713_vm8, %v187_v12, %v188_v13  ;;  %v197_v31 = vstv %s648_s30  ;;  %vm805_vm8 = vcmp.lt.f32.partialorder %v475_v0, %v57_v58 }
  0x3c   :  { %s733_s8 = sld [smem:[#allocation2 + $0x15]]  ;;  %v201_v32 = vstv %s663_s4  ;;  %v984_v39 = vsel %vm805_vm8, 4294967295, %v983_v39  ;;  %v986_v40 = vsel %vm810_vm6, 4294967295, %v985_v40  ;;  %v192_v42 = vsel %vm740_vm11, %v191_v27, %v189_v25 }
  0x3d   :  { %s749_s9 = sld [smem:[#allocation6 + $0x15]]  ;;  %v193_v43 = vsel %vm745_vm12, %v191_v27, %v190_v26  ;;  %vm822_vm8 = vcmp.lt.f32.partialorder %v475_v0, %v197_v31  ;;  %vm827_vm6 = vcmp.lt.f32.partialorder %v475_v0, %v201_v32  ;;  %v215_v57 = vstv %s667_s5 }
  0x3e   :  { %v206_v28 = vstv %s679_s6  ;;  %s767_s10 = sld [smem:[#allocation6 + $0x16]]  ;;  %v988_v44 = vsel %vm822_vm8, 4294967295, %v987_v44  ;;  %vm834_vm10 = vcmp.lt.f32.partialorder %v477_v1, %v201_v32  ;;  %vm860_vm14 = vcmp.lt.f32.partialorder %v477_v1, %v197_v31 }
  0x3f   :  { %s781_s11 = sld [smem:[#allocation2 + $0x17]]  ;;  %vm796_vm7 = vcmp.lt.f32.partialorder %v475_v0, %v206_v28  ;;  %v211_v37 = vstv %s695_s0  ;;  %vm208_vm9 = vcmp.lt.f32.partialorder %v477_v1, %v206_v28  ;;  %v194_v17 = vsel %vm770_vm15, %v174_v35, %v192_v42 }
  0x40   :  { %v212_v38 = vstv %s705_s1  ;;  %s802_s12 = sld [smem:[#allocation6 + $0x17]]  ;;  %vm1000_vm5 = vnez %v988_v44  ;;  %vm1004_vm15 = vnez %v986_v40 }
  0x41   :  { %s317_s13 = sld [smem:[#allocation6 + $0x18]]  ;;  %v219_v58 = vstv %s719_s7  ;;  %v213_v62 = vsel %vm796_vm7, %v211_v37, %v212_v38  ;;  %v214_v5 = vsel %vm208_vm9, %v211_v37, %v212_v38 }
  0x42   :  { %v223_v63 = vstv %s733_s8  ;;  %vm846_vm4 = vcmp.lt.f32.partialorder %v475_v0, %v219_v58  ;;  %vm851_vm8 = vcmp.lt.f32.partialorder %v477_v1, %v219_v58  ;;  %v216_v14 = vsel %vm827_vm6, %v215_v57, %v213_v62 }
  0x43   :  { %v228_v4 = vstv %s749_s9  ;;  %vm224_vm11 = vcmp.lt.f32.partialorder %v475_v0, %v223_v63  ;;  %vm225_vm12 = vcmp.lt.f32.partialorder %v477_v1, %v223_v63  ;;  %v217_v15 = vsel %vm834_vm10, %v215_v57, %v214_v5 }
  0x44   :  { %v229_v6 = vstv %s767_s10 }
  0x45   :  { %v230_v9 = vsel %vm224_vm11, %v228_v4, %v229_v6  ;;  %v233_v10 = vstv %s781_s11  ;;  %v231_v11 = vsel %vm225_vm12, %v228_v4, %v229_v6 }
  0x46   :  { %vm234_vm7 = vcmp.lt.f32.partialorder %v475_v0, %v233_v10  ;;  %vm235_vm9 = vcmp.lt.f32.partialorder %v477_v1, %v233_v10  ;;  %v238_v12 = vstv %s802_s12  ;;  %v195_v0 = vsel %vm775_vm0, %v175_v41, %v193_v43 }
  0x47   :  { %v239_v16 = vstv %s317_s13  ;;  %v148_v1 = vsel %vm752_vm13, %v104_v60, %v146_v2  ;;  %vm1003_vm13 = vnez %v984_v39 }
  0x48   :  { %v240_v19 = vsel %vm234_vm7, %v238_v12, %v239_v16  ;;  %v241_v20 = vsel %vm235_vm9, %v238_v12, %v239_v16 }
  0x49   :  { %v242_v18 = vsel %vm846_vm4, %v230_v9, %v240_v19  ;;  %v243_v47 = vsel %vm851_vm8, %v231_v11, %v241_v20 }
  0x4a   :  { %v244_v46 = vsel %vm1000_vm5, %v216_v14, %v242_v18  ;;  %v245_v48 = vsel %vm860_vm14, %v217_v15, %v243_v47 }
  0x4b   :  { %v246_v49 = vsel %vm1001_vm1, %v194_v17, %v244_v46  ;;  %v247_v50 = vsel %vm1002_vm2, %v195_v0, %v245_v48 }
  0x4c   :  { %v248_v52 = vsel %vm1003_vm13, %v148_v1, %v246_v49  ;;  %v249_v53 = vsel %vm1004_vm15, %v149_v51, %v247_v50 }
  0x4d   :  { %250 = vst [vmem:[#allocation9] sm:$0xff] %v248_v52 }
  0x4e   :  { %251 = vst [vmem:[#allocation9 + $0x8] sm:$0xff] %v249_v53 }
  0x4f   :  { %262 = dma.vmem_to_hbm [thread:$0]  %s258_s15, 256, %s260_s18, [#allocation4]  }
  0x50   :  { %400 = dma.done.wait [#allocation4], 256  }
  0x51   :  { %401 = vsyncadd [#allocation4], 4294967040 }
  0x52   :  { %267 = vsyncpa [#allocation3], 1 }
  0x53   :  { %268 = vsyncpa [#allocation4], 1 }
  0x54   :  { %269 = vsyncpa [#allocation5], 1 }
  0x55   :  { %270 = vsyncpa [#allocation7], 1 }

</bundles_post_ra>
